<compile_context>
chip_gen: v5e
topology: v5e:2x2
jax: 0.10.0
libtpu: 0.0.40
codegen_flags: <defaults>
</compile_context>

<pallas_src>
import functools

import jax
import jax.numpy as jnp
from jax.experimental import pallas as pl
from jax.experimental.pallas import tpu as pltpu


# ------------------------------ helpers -------------------------------------
def _round_up(n, m):
    return ((n + m - 1) // m) * m


def _vmem_capacity_bytes():
    try:
        return int(pltpu.get_tpu_info().vmem_capacity_bytes)
    except Exception:
        return 64 << 20  # conservative v7x per-TC floor (v5e/v6e have 128 MiB)


def _weight_bytes(in_sz, Hp, out_sz, weight_bufs):
    bf16, f32 = 2, 4
    return weight_bufs * (in_sz * Hp * bf16 + Hp * out_sz * bf16 + Hp * f32 + out_sz * f32)


def _vmem_limit_bytes(TB, in_sz, Hp, out_sz, weight_bufs):
    bf16, f32 = 2, 4
    weights = _weight_bytes(in_sz, Hp, out_sz, weight_bufs)
    streamed = 2 * TB * in_sz * bf16 + 2 * TB * out_sz * f32       # double-buffered x / out
    body = TB * Hp * f32 + TB * Hp * bf16 + TB * out_sz * f32      # h (f32), h (bf16), y
    budget = weights + streamed + body + (8 << 20)                 # compiler scratch headroom
    cap = (_vmem_capacity_bytes() * 3) // 4                        # <= 75% of physical VMEM
    return int(min(max(budget, 16 << 20), cap))


# ----------------------------- Pallas kernel --------------------------------
def _mlp_kernel(x_ref, w1_ref, b1_ref, w2_ref, b2_ref, o_ref):
    # fc1: bf16 MXU matmul with f32 accumulation; bias + ReLU in f32.
    h = jnp.dot(x_ref[...], w1_ref[...], preferred_element_type=jnp.float32)
    h = jnp.maximum(h + b1_ref[...], 0.0)                 # b1 is (1, Hp) -> broadcasts
    # fc2 (de-padded N = output_size columns only).
    y = jnp.dot(h.astype(jnp.bfloat16), w2_ref[...],
                preferred_element_type=jnp.float32)
    o_ref[...] = (y + b2_ref[...]).astype(o_ref.dtype)


# --------------------------- one-time param prep -----------------------------
def prepare_params(w1, b1, w2, b2):
    """Pad + cast weights once (outside the per-call path).

    w1: [in, hidden], b1: [hidden], w2: [hidden, out], b2: [out]
    (weights stored transposed vs. PyTorch's [out, in]).
    Only the hidden dim is padded (to a multiple of 128); the input/output
    feature dims stay at their logical sizes so no per-call de-padding is needed.
    """
    in_sz, hid = w1.shape
    out_sz = w2.shape[1]
    Hp = _round_up(max(hid, 128), 128)

    w1p = jnp.zeros((in_sz, Hp), jnp.bfloat16).at[:, :hid].set(w1.astype(jnp.bfloat16))
    b1p = jnp.zeros((1, Hp), jnp.float32).at[0, :hid].set(b1.astype(jnp.float32))
    w2p = jnp.zeros((Hp, out_sz), jnp.bfloat16).at[:hid, :].set(w2.astype(jnp.bfloat16))
    b2p = b2.astype(jnp.float32).reshape(1, out_sz)
    return w1p, b1p, w2p, b2p


# ------------------------------ forward pass ---------------------------------
@functools.partial(jax.jit, static_argnames=("batch_tile", "single_buffer_weights"))
def _forward_impl(x, w1p, b1p, w2p, b2p, batch_tile, single_buffer_weights):
    in_sz, Hp = w1p.shape
    out_sz = w2p.shape[1]
    B = x.shape[0]
    weight_bufs = 1 if single_buffer_weights else 2

    # TODO(synk): add a hidden-dim-tiled fallback ("arbitrary" grid axis + f32
    # accumulator with pl.when init/finalize) for weight matrices that exceed the
    # per-generation VMEM budget; at these shapes weights are always resident.

    # Batch tile: multiple of 16 (bf16 sublane packing); capped at ceil(B/2) so the
    # "parallel" batch grid has >= 2 steps whenever possible (keeps both v7x TCs
    # busy), and capped by the VMEM budget for very large Hp.
    vmem_cap = (_vmem_capacity_bytes() * 3) // 4
    row_bytes = 2 * in_sz * 2 + 2 * out_sz * 4 + Hp * 6 + out_sz * 4
    avail = max(vmem_cap - _weight_bytes(in_sz, Hp, out_sz, weight_bufs) - (8 << 20), row_bytes)
    tb_vmem = max(16, (avail // row_bytes) // 16 * 16)
    TB = max(16, min(_round_up(batch_tile, 16),
                     _round_up((B + 1) // 2, 16),
                     tb_vmem))
    Bp = _round_up(max(B, TB), TB)

    # Only the batch dim of x is padded per call (fuses under jit); lanes stay in_sz.
    x_bf16 = x.astype(jnp.bfloat16)
    xp = x_bf16 if Bp == B else jnp.zeros((Bp, in_sz), jnp.bfloat16).at[:B].set(x_bf16)

    def w_spec(shape):
        # Constant (0,0) index_map -> weights stay VMEM resident across the grid;
        # single-buffering avoids a dead second copy of each weight in VMEM.
        if single_buffer_weights:
            return pl.BlockSpec(shape, lambda i: (0, 0), pipeline_mode=pl.Buffered(1))
        return pl.BlockSpec(shape, lambda i: (0, 0))

    out_padded = pl.pallas_call(
        _mlp_kernel,
        out_shape=jax.ShapeDtypeStruct((Bp, out_sz), jnp.float32),
        grid=(Bp // TB,),
        in_specs=[
            pl.BlockSpec((TB, in_sz), lambda i: (i, 0)),  # x: streams over batch, no lane pad
            w_spec((in_sz, Hp)),                          # w1: VMEM-resident
            w_spec((1, Hp)),                              # b1: VMEM-resident
            w_spec((Hp, out_sz)),                         # w2: VMEM-resident
            w_spec((1, out_sz)),                          # b2: VMEM-resident
        ],
        out_specs=pl.BlockSpec((TB, out_sz), lambda i: (i, 0)),
        compiler_params=pltpu.CompilerParams(
            dimension_semantics=("parallel",),            # megacore-shard batch on v7x
            vmem_limit_bytes=_vmem_limit_bytes(TB, in_sz, Hp, out_sz, weight_bufs),
        ),
    )(xp, w1p, b1p, w2p, b2p)

    return out_padded if Bp == B else out_padded[:B]


_SINGLE_BUFFER_WEIGHTS = [True]  # flipped to False if this runtime rejects pl.Buffered(1)


def conceivo_net_forward(x, params, batch_tile=1024):
    """ConceivoNet forward (fc1 -> ReLU -> fc2) via one fused Pallas kernel.

    x : [B, input_size] float32; params: output of prepare_params().
    Returns [B, output_size] float32.
    """
    w1p, b1p, w2p, b2p = params
    try:
        return _forward_impl(x, w1p, b1p, w2p, b2p, batch_tile, _SINGLE_BUFFER_WEIGHTS[0])
    except Exception:
        if not _SINGLE_BUFFER_WEIGHTS[0]:
            raise
        # Fallback: default (double-buffered) weight blocks — same numerics.
        _SINGLE_BUFFER_WEIGHTS[0] = False
        return _forward_impl(x, w1p, b1p, w2p, b2p, batch_tile, False)


# ------------------------- deterministic param init --------------------------
def init_params(key, input_size=3, hidden_size=10, output_size=1):
    """Mimics PyTorch nn.Linear default init: U(-1/sqrt(fan_in), 1/sqrt(fan_in))."""
    k1, k2, k3, k4 = jax.random.split(key, 4)
    bound1 = 1.0 / jnp.sqrt(jnp.float32(input_size))
    bound2 = 1.0 / jnp.sqrt(jnp.float32(hidden_size))
    # Stored as [in, out] (transposed relative to PyTorch's [out, in]).
    w1 = jax.random.uniform(k1, (input_size, hidden_size), jnp.float32, -bound1, bound1)
    b1 = jax.random.uniform(k2, (hidden_size,), jnp.float32, -bound1, bound1)
    w2 = jax.random.uniform(k3, (hidden_size, output_size), jnp.float32, -bound2, bound2)
    b2 = jax.random.uniform(k4, (output_size,), jnp.float32, -bound2, bound2)
    return w1, b1, w2, b2


if __name__ == "__main__":
    key = jax.random.PRNGKey(0)
    k_params, k_x, k_x2 = jax.random.split(key, 3)

    input_size, hidden_size, output_size = 3, 10, 1
    batch = 2

    w1, b1, w2, b2 = init_params(k_params, input_size, hidden_size, output_size)
    params = prepare_params(w1, b1, w2, b2)  # one-time padding/cast

    bf = lambda a: a.astype(jnp.bfloat16).astype(jnp.float32)

    def ref_bf16(xi):  # matches kernel numerics (bf16 matmul inputs, f32 accum)
        h = jnp.maximum(bf(xi) @ bf(w1) + b1, 0.0)
        return bf(h) @ bf(w2) + b2

    def ref_f32(xi):   # pure-f32 math == PyTorch module semantics
        return jnp.maximum(xi @ w1 + b1, 0.0) @ w2 + b2

    # --- small batch (single grid step) ---
    x = jax.random.normal(k_x, (batch, input_size), jnp.float32)
    out = jax.block_until_ready(conceivo_net_forward(x, params))
    assert out.shape == (batch, output_size)
    assert jnp.allclose(out, ref_bf16(x), atol=1e-4, rtol=1e-4)
    assert jnp.allclose(out, ref_f32(x), atol=5e-2, rtol=5e-2)

    # --- larger, non-multiple-of-tile batch (multi-step grid + batch padding) ---
    x2 = jax.random.normal(k_x2, (50, input_size), jnp.float32)
    out2 = jax.block_until_ready(conceivo_net_forward(x2, params))
    assert out2.shape == (50, output_size)
    assert jnp.allclose(out2, ref_bf16(x2), atol=1e-3, rtol=1e-3)
    assert jnp.allclose(out2, ref_f32(x2), atol=5e-2, rtol=5e-2)

    print("KERNEL_OK")
</pallas_src>

<mosaic_0001>
module attributes {stable_mosaic.version = 11 : i64} {
  func.func @_mlp_kernel(%arg0: i32, %arg1: memref<16x3xbf16, #tpu.memory_space<vmem>>, %arg2: memref<3x128xbf16, #tpu.memory_space<vmem>>, %arg3: memref<1x128xf32, #tpu.memory_space<vmem>>, %arg4: memref<128x1xbf16, #tpu.memory_space<vmem>>, %arg5: memref<1x1xf32, #tpu.memory_space<vmem>>, %arg6: memref<16x1xf32, #tpu.memory_space<vmem>>) attributes {dimension_semantics = [#tpu.dimension_semantics<parallel>], iteration_bounds = array<i64: 1>, scalar_prefetch = 0 : i64, scratch_operands = 0 : i64, tpu.core_type = #tpu.core_type<tc>, window_params = [{transform_indices = @transform_0, window_bounds = array<i64: 16, 3>}, {pipeline_mode = #tpu.pipeline_mode<synchronous>, transform_indices = @transform_1, window_bounds = array<i64: 3, 128>}, {pipeline_mode = #tpu.pipeline_mode<synchronous>, transform_indices = @transform_2, window_bounds = array<i64: 1, 128>}, {pipeline_mode = #tpu.pipeline_mode<synchronous>, transform_indices = @transform_3, window_bounds = array<i64: 128, 1>}, {pipeline_mode = #tpu.pipeline_mode<synchronous>, transform_indices = @transform_4, window_bounds = array<i64: 1, 1>}, {transform_indices = @transform_5, window_bounds = array<i64: 16, 1>}]} {
    %c0 = arith.constant 0 : index
    %c0_0 = arith.constant 0 : index
    %0 = vector.load %arg1[%c0, %c0_0] : memref<16x3xbf16, #tpu.memory_space<vmem>>, vector<16x3xbf16>
    %c0_1 = arith.constant 0 : index
    %c0_2 = arith.constant 0 : index
    %1 = vector.load %arg2[%c0_1, %c0_2] : memref<3x128xbf16, #tpu.memory_space<vmem>>, vector<3x128xbf16>
    %cst = arith.constant dense<0.000000e+00> : vector<16x128xf32>
    %2 = tpu.matmul %0, %1, %cst {dimension_numbers = #tpu.dot_dimension_numbers<[1], [0], [0], [1], [0, 0, 1, 1], [], []>} : vector<16x3xbf16>, vector<3x128xbf16>, vector<16x128xf32> -> vector<16x128xf32>
    %c0_3 = arith.constant 0 : index
    %c0_4 = arith.constant 0 : index
    %3 = vector.load %arg3[%c0_3, %c0_4] : memref<1x128xf32, #tpu.memory_space<vmem>>, vector<1x128xf32>
    %4 = vector.broadcast %3 : vector<1x128xf32> to vector<16x128xf32>
    %5 = arith.addf %2, %4 : vector<16x128xf32>
    %cst_5 = arith.constant 0.000000e+00 : f32
    %6 = vector.broadcast %cst_5 : f32 to vector<16x128xf32>
    %7 = arith.maximumf %5, %6 : vector<16x128xf32>
    %8 = arith.truncf %7 : vector<16x128xf32> to vector<16x128xbf16>
    %c0_6 = arith.constant 0 : index
    %c0_7 = arith.constant 0 : index
    %9 = vector.load %arg4[%c0_6, %c0_7] : memref<128x1xbf16, #tpu.memory_space<vmem>>, vector<128x1xbf16>
    %cst_8 = arith.constant dense<0.000000e+00> : vector<16x1xf32>
    %10 = tpu.matmul %8, %9, %cst_8 {dimension_numbers = #tpu.dot_dimension_numbers<[1], [0], [0], [1], [0, 0, 1, 1], [], []>} : vector<16x128xbf16>, vector<128x1xbf16>, vector<16x1xf32> -> vector<16x1xf32>
    %c0_9 = arith.constant 0 : index
    %c0_10 = arith.constant 0 : index
    %11 = vector.load %arg5[%c0_9, %c0_10] : memref<1x1xf32, #tpu.memory_space<vmem>>, vector<1x1xf32>
    %12 = vector.broadcast %11 : vector<1x1xf32> to vector<16x1xf32>
    %13 = arith.addf %10, %12 : vector<16x1xf32>
    %c0_11 = arith.constant 0 : index
    %c0_12 = arith.constant 0 : index
    %14 = vector.load %arg6[%c0_11, %c0_12] : memref<16x1xf32, #tpu.memory_space<vmem>>, vector<16x1xf32>
    tpu.vector_store %arg6[%c0_11, %c0_12], %13 {strides = array<i32>} : memref<16x1xf32, #tpu.memory_space<vmem>>, vector<16x1xf32>,
    return
  }
  func.func @transform_0(%arg0: i32) -> (i32, i32) {
    %c0_i32 = arith.constant 0 : i32
    %c0_i32_0 = arith.constant 0 : i32
    return %arg0, %c0_i32 : i32, i32
  }
  func.func @transform_1(%arg0: i32) -> (i32, i32) {
    %c0_i32 = arith.constant 0 : i32
    %c0_i32_0 = arith.constant 0 : i32
    %c0_i32_1 = arith.constant 0 : i32
    return %c0_i32, %c0_i32_0 : i32, i32
  }
  func.func @transform_2(%arg0: i32) -> (i32, i32) {
    %c0_i32 = arith.constant 0 : i32
    %c0_i32_0 = arith.constant 0 : i32
    %c0_i32_1 = arith.constant 0 : i32
    return %c0_i32, %c0_i32_0 : i32, i32
  }
  func.func @transform_3(%arg0: i32) -> (i32, i32) {
    %c0_i32 = arith.constant 0 : i32
    %c0_i32_0 = arith.constant 0 : i32
    %c0_i32_1 = arith.constant 0 : i32
    return %c0_i32, %c0_i32_0 : i32, i32
  }
  func.func @transform_4(%arg0: i32) -> (i32, i32) {
    %c0_i32 = arith.constant 0 : i32
    %c0_i32_0 = arith.constant 0 : i32
    %c0_i32_1 = arith.constant 0 : i32
    return %c0_i32, %c0_i32_0 : i32, i32
  }
  func.func @transform_5(%arg0: i32) -> (i32, i32) {
    %c0_i32 = arith.constant 0 : i32
    %c0_i32_0 = arith.constant 0 : i32
    return %arg0, %c0_i32 : i32, i32
  }
}

module attributes {stable_mosaic.version = 11 : i64} {
  func.func @_mlp_kernel(%arg0: i32, %arg1: memref<16x3xbf16, #tpu.memory_space<vmem>>, %arg2: memref<3x128xbf16, #tpu.memory_space<vmem>>, %arg3: memref<1x128xf32, #tpu.memory_space<vmem>>, %arg4: memref<128x1xbf16, #tpu.memory_space<vmem>>, %arg5: memref<1x1xf32, #tpu.memory_space<vmem>>, %arg6: memref<16x1xf32, #tpu.memory_space<vmem>>) attributes {dimension_semantics = [#tpu.dimension_semantics<parallel>], iteration_bounds = array<i64: 1>, scalar_prefetch = 0 : i64, scratch_operands = 0 : i64, tpu.core_type = #tpu.core_type<tc>, window_params = [{transform_indices = @transform_0, window_bounds = array<i64: 16, 3>}, {pipeline_mode = #tpu.pipeline_mode<synchronous>, transform_indices = @transform_1, window_bounds = array<i64: 3, 128>}, {pipeline_mode = #tpu.pipeline_mode<synchronous>, transform_indices = @transform_2, window_bounds = array<i64: 1, 128>}, {pipeline_mode = #tpu.pipeline_mode<synchronous>, transform_indices = @transform_3, window_bounds = array<i64: 128, 1>}, {pipeline_mode = #tpu.pipeline_mode<synchronous>, transform_indices = @transform_4, window_bounds = array<i64: 1, 1>}, {transform_indices = @transform_5, window_bounds = array<i64: 16, 1>}]} {
    %c0 = arith.constant 0 : index
    %c0_0 = arith.constant 0 : index
    %0 = vector.load %arg1[%c0, %c0_0] : memref<16x3xbf16, #tpu.memory_space<vmem>>, vector<16x3xbf16>
    %c0_1 = arith.constant 0 : index
    %c0_2 = arith.constant 0 : index
    %1 = vector.load %arg2[%c0_1, %c0_2] : memref<3x128xbf16, #tpu.memory_space<vmem>>, vector<3x128xbf16>
    %cst = arith.constant dense<0.000000e+00> : vector<16x128xf32>
    %2 = tpu.matmul %0, %1, %cst {dimension_numbers = #tpu.dot_dimension_numbers<[1], [0], [0], [1], [0, 0, 1, 1], [], []>} : vector<16x3xbf16>, vector<3x128xbf16>, vector<16x128xf32> -> vector<16x128xf32>
    %c0_3 = arith.constant 0 : index
    %c0_4 = arith.constant 0 : index
    %3 = vector.load %arg3[%c0_3, %c0_4] : memref<1x128xf32, #tpu.memory_space<vmem>>, vector<1x128xf32>
    %4 = vector.broadcast %3 : vector<1x128xf32> to vector<16x128xf32>
    %5 = arith.addf %2, %4 : vector<16x128xf32>
    %cst_5 = arith.constant 0.000000e+00 : f32
    %6 = vector.broadcast %cst_5 : f32 to vector<16x128xf32>
    %7 = arith.maximumf %5, %6 : vector<16x128xf32>
    %8 = arith.truncf %7 : vector<16x128xf32> to vector<16x128xbf16>
    %c0_6 = arith.constant 0 : index
    %c0_7 = arith.constant 0 : index
    %9 = vector.load %arg4[%c0_6, %c0_7] : memref<128x1xbf16, #tpu.memory_space<vmem>>, vector<128x1xbf16>
    %cst_8 = arith.constant dense<0.000000e+00> : vector<16x1xf32>
    %10 = tpu.matmul %8, %9, %cst_8 {dimension_numbers = #tpu.dot_dimension_numbers<[1], [0], [0], [1], [0, 0, 1, 1], [], []>} : vector<16x128xbf16>, vector<128x1xbf16>, vector<16x1xf32> -> vector<16x1xf32>
    %c0_9 = arith.constant 0 : index
    %c0_10 = arith.constant 0 : index
    %11 = vector.load %arg5[%c0_9, %c0_10] : memref<1x1xf32, #tpu.memory_space<vmem>>, vector<1x1xf32>
    %12 = vector.broadcast %11 : vector<1x1xf32> to vector<16x1xf32>
    %13 = arith.addf %10, %12 : vector<16x1xf32>
    %c0_11 = arith.constant 0 : index
    %c0_12 = arith.constant 0 : index
    %14 = vector.load %arg6[%c0_11, %c0_12] : memref<16x1xf32, #tpu.memory_space<vmem>>, vector<16x1xf32>
    tpu.vector_store %arg6[%c0_11, %c0_12], %13 {strides = array<i32>} : memref<16x1xf32, #tpu.memory_space<vmem>>, vector<16x1xf32>,
    return
  }
  func.func @transform_0(%arg0: i32) -> (i32, i32) {
    %c0_i32 = arith.constant 0 : i32
    %c0_i32_0 = arith.constant 0 : i32
    return %arg0, %c0_i32 : i32, i32
  }
  func.func @transform_1(%arg0: i32) -> (i32, i32) {
    %c0_i32 = arith.constant 0 : i32
    %c0_i32_0 = arith.constant 0 : i32
    %c0_i32_1 = arith.constant 0 : i32
    return %c0_i32, %c0_i32_0 : i32, i32
  }
  func.func @transform_2(%arg0: i32) -> (i32, i32) {
    %c0_i32 = arith.constant 0 : i32
    %c0_i32_0 = arith.constant 0 : i32
    %c0_i32_1 = arith.constant 0 : i32
    return %c0_i32, %c0_i32_0 : i32, i32
  }
  func.func @transform_3(%arg0: i32) -> (i32, i32) {
    %c0_i32 = arith.constant 0 : i32
    %c0_i32_0 = arith.constant 0 : i32
    %c0_i32_1 = arith.constant 0 : i32
    return %c0_i32, %c0_i32_0 : i32, i32
  }
  func.func @transform_4(%arg0: i32) -> (i32, i32) {
    %c0_i32 = arith.constant 0 : i32
    %c0_i32_0 = arith.constant 0 : i32
    %c0_i32_1 = arith.constant 0 : i32
    return %c0_i32, %c0_i32_0 : i32, i32
  }
  func.func @transform_5(%arg0: i32) -> (i32, i32) {
    %c0_i32 = arith.constant 0 : i32
    %c0_i32_0 = arith.constant 0 : i32
    return %arg0, %c0_i32 : i32, i32
  }
}

</mosaic_0001>

<bundles_post_ra>
// kernel: _forward_impl.1
= control target key start
LH: loop header
LB: loop body
LE: loop exit
PB: predicated region body
PF: predicated region fallthrough
CT: control target
= control target key end

     0   :  { %vm39_vm0 = vcmask 1040384   ;;  %vm40_vm1 = vcmask 1041408   ;;  %v201_v1 = vmov 65535   ;;  %vm35_vm2 = vcmask 23552   ;;  %s274_s1 = inlined_call_operand.vmem [shape: bf16[3,128], index: 1, kind: input, shape index: {}]   ;;  %s275_s3 = inlined_call_operand.vmem [shape: bf16[128,1], index: 3, kind: input, shape index: {}]   ;;  %s276_s0 = inlined_call_operand.vmem [shape: bf16[16,3], index: 0, kind: input, shape index: {}]   ;;  %s277_s2 = inlined_call_operand.vmem [shape: f32[1,128], index: 2, kind: input, shape index: {}]   ;;  %s278_s4 = inlined_call_operand.<no memory space> [shape: f32[1,1], index: 4, kind: input, shape index: {}]   ;;  %s279_s5 = inlined_call_operand.vmem [shape: f32[16,1], index: 5, kind: output, shape index: {}]  }
   0x1   :  { %v25_v0 = vld [vmem:[%s274_s1] sm:$0x3]  ;;  %v41_v2 = vsel %vm39_vm0, 4294967295, %v201_v1  ;;  %v197_v3 = vld [vmem:[%s275_s3 + $0x38] sm:$0xff]  ;;  %v196_v6 = vld [vmem:[%s275_s3 + $0x30] sm:$0xff]  ;;  %v10_v14 = vstv %s278_s4  ;;  %vm145_vm3 = vcmask 7168  }
   0x2   :  { %v42_v4 = vsel %vm40_vm1, %v41_v2, 0  ;;  %131 = vmatpush.bf16.msra.mxu1 %v197_v3  ;;  %v189_v7 = vld [vmem:[%s276_s0] sm:$0xff]  ;;  %v195_v8 = vld [vmem:[%s275_s3 + $0x28] sm:$0xff]  ;;  %v193_v10 = vld [vmem:[%s275_s3 + $0x18] sm:$0xff]  ;;  %11 = vst [vmem:[#allocation2] sm:$0x1] %v10_v14 }
   0x3   :  { %v44_v5 = vand.u32 %v42_v4, %v25_v0  ;;  %v194_v9 = vld [vmem:[%s275_s3 + $0x20] sm:$0xff]  ;;  %v192_v11 = vld [vmem:[%s275_s3 + $0x10] sm:$0xff]  ;;  %v191_v12 = vld [vmem:[%s275_s3 + $0x8] sm:$0xff] }
   0x4   :  { %v190_v13 = vld [vmem:[%s275_s3] sm:$0xff] }
   0x5   :  { %53 = vmatpush.bf16.msra.mxu0 %v44_v5  ;;  %v199_v16 = vld [vmem:[%s277_s2] ss:$0 sm:$0xff] }
   0x6   :  { %132 = vmatpush.bf16.msra.mxu1 %v196_v6 }
   0x8   :  { %156 = vmatmul.msk.bf16.vlgmr.msra.gmra.mxu0 %vm35_vm2, %v189_v7 }
   0x9   :  { %v200_v23 = vld [vmem:[#allocation2] ss:$0 sm:$0xff] }
   0xa   :  { %133 = vmatpush.bf16.msra.mxu1 %v195_v8 }
   0xe   :  { %134 = vmatpush.bf16.msra.mxu1 %v194_v9 }
  0x12   :  { %135 = vmatpush.bf16.msra.mxu1 %v193_v10 }
  0x16   :  { %136 = vmatpush.bf16.msra.mxu1 %v192_v11 }
  0x1a   :  { %137 = vmatpush.bf16.msra.mxu1 %v191_v12 }
  0x1e   :  { %138 = vmatpush.bf16.msra.mxu1 %v190_v13 }
  0x85   :  { %v55_v15 = vpop.f32.mrf.mxu0 }
  0x86   :  { %v56_v17 = vadd.f32 %v199_v16, %v55_v15 }
  0x88   :  { %v60_v20 = vmax.f32 %v56_v17, 0.0 }
  0x8d   :  { %v57_v18 = vpop.f32.mrf.mxu0 }
  0x8e   :  { %v58_v19 = vadd.f32 %v199_v16, %v57_v18 }
  0x90   :  { %v61_v21 = vmax.f32 %v58_v19, 0.0 }
  0x92   :  { %v62_v22 = vpack.c.bf16 %v61_v21, %v60_v20 }
  0x94   :  { %139 = vmatmul.bf16.vlgmr.msra.gmra.mxu1 %v62_v22 }
 0x111   :  { %v140_v24 = vpop.f32.mrf.mxu1 }
 0x112   :  { %v141_v25 = vadd.f32 %v200_v23, %v140_v24 }
 0x114   :  { %146 = vst.msk [vmem:[%s279_s5] sm:$0xff] %vm145_vm3, %v141_v25 }
 0x119   :  { %v142_v26 = vpop.f32.mrf.mxu1 }
 0x11a   :  { %v143_v27 = vadd.f32 %v200_v23, %v142_v26 }
 0x11c   :  { %147 = vst.msk [vmem:[%s279_s5 + $0x8] sm:$0xff] %vm145_vm3, %v143_v27 }

// kernel: _forward_impl.1
= control target key start
LH: loop header
LB: loop body
LE: loop exit
PB: predicated region body
PF: predicated region fallthrough
CT: control target
= control target key end

     0   :  { %vm39_vm0 = vcmask 1040384   ;;  %vm40_vm1 = vcmask 1041408   ;;  %v201_v1 = vmov 65535   ;;  %vm35_vm2 = vcmask 23552   ;;  %s274_s1 = inlined_call_operand.vmem [shape: bf16[3,128], index: 1, kind: input, shape index: {}]   ;;  %s275_s3 = inlined_call_operand.vmem [shape: bf16[128,1], index: 3, kind: input, shape index: {}]   ;;  %s276_s0 = inlined_call_operand.vmem [shape: bf16[16,3], index: 0, kind: input, shape index: {}]   ;;  %s277_s2 = inlined_call_operand.vmem [shape: f32[1,128], index: 2, kind: input, shape index: {}]   ;;  %s278_s4 = inlined_call_operand.<no memory space> [shape: f32[1,1], index: 4, kind: input, shape index: {}]   ;;  %s279_s5 = inlined_call_operand.vmem [shape: f32[16,1], index: 5, kind: output, shape index: {}]  }
   0x1   :  { %v25_v0 = vld [vmem:[%s274_s1] sm:$0x3]  ;;  %v41_v2 = vsel %vm39_vm0, 4294967295, %v201_v1  ;;  %v197_v3 = vld [vmem:[%s275_s3 + $0x38] sm:$0xff]  ;;  %v196_v6 = vld [vmem:[%s275_s3 + $0x30] sm:$0xff]  ;;  %v10_v14 = vstv %s278_s4  ;;  %vm145_vm3 = vcmask 7168  }
   0x2   :  { %v42_v4 = vsel %vm40_vm1, %v41_v2, 0  ;;  %131 = vmatpush.bf16.msra.mxu1 %v197_v3  ;;  %v189_v7 = vld [vmem:[%s276_s0] sm:$0xff]  ;;  %v195_v8 = vld [vmem:[%s275_s3 + $0x28] sm:$0xff]  ;;  %v193_v10 = vld [vmem:[%s275_s3 + $0x18] sm:$0xff]  ;;  %11 = vst [vmem:[#allocation2] sm:$0x1] %v10_v14 }
   0x3   :  { %v44_v5 = vand.u32 %v42_v4, %v25_v0  ;;  %v194_v9 = vld [vmem:[%s275_s3 + $0x20] sm:$0xff]  ;;  %v192_v11 = vld [vmem:[%s275_s3 + $0x10] sm:$0xff]  ;;  %v191_v12 = vld [vmem:[%s275_s3 + $0x8] sm:$0xff] }
   0x4   :  { %v190_v13 = vld [vmem:[%s275_s3] sm:$0xff] }
   0x5   :  { %53 = vmatpush.bf16.msra.mxu0 %v44_v5  ;;  %v199_v16 = vld [vmem:[%s277_s2] ss:$0 sm:$0xff] }
   0x6   :  { %132 = vmatpush.bf16.msra.mxu1 %v196_v6 }
   0x8   :  { %156 = vmatmul.msk.bf16.vlgmr.msra.gmra.mxu0 %vm35_vm2, %v189_v7 }
   0x9   :  { %v200_v23 = vld [vmem:[#allocation2] ss:$0 sm:$0xff] }
   0xa   :  { %133 = vmatpush.bf16.msra.mxu1 %v195_v8 }
   0xe   :  { %134 = vmatpush.bf16.msra.mxu1 %v194_v9 }
  0x12   :  { %135 = vmatpush.bf16.msra.mxu1 %v193_v10 }
  0x16   :  { %136 = vmatpush.bf16.msra.mxu1 %v192_v11 }
  0x1a   :  { %137 = vmatpush.bf16.msra.mxu1 %v191_v12 }
  0x1e   :  { %138 = vmatpush.bf16.msra.mxu1 %v190_v13 }
  0x85   :  { %v55_v15 = vpop.f32.mrf.mxu0 }
  0x86   :  { %v56_v17 = vadd.f32 %v199_v16, %v55_v15 }
  0x88   :  { %v60_v20 = vmax.f32 %v56_v17, 0.0 }
  0x8d   :  { %v57_v18 = vpop.f32.mrf.mxu0 }
  0x8e   :  { %v58_v19 = vadd.f32 %v199_v16, %v57_v18 }
  0x90   :  { %v61_v21 = vmax.f32 %v58_v19, 0.0 }
  0x92   :  { %v62_v22 = vpack.c.bf16 %v61_v21, %v60_v20 }
  0x94   :  { %139 = vmatmul.bf16.vlgmr.msra.gmra.mxu1 %v62_v22 }
 0x111   :  { %v140_v24 = vpop.f32.mrf.mxu1 }
 0x112   :  { %v141_v25 = vadd.f32 %v200_v23, %v140_v24 }
 0x114   :  { %146 = vst.msk [vmem:[%s279_s5] sm:$0xff] %vm145_vm3, %v141_v25 }
 0x119   :  { %v142_v26 = vpop.f32.mrf.mxu1 }
 0x11a   :  { %v143_v27 = vadd.f32 %v200_v23, %v142_v26 }
 0x11c   :  { %147 = vst.msk [vmem:[%s279_s5 + $0x8] sm:$0xff] %vm145_vm3, %v143_v27 }

</bundles_post_ra>
